<compile_context>
chip_gen: v5e
topology: v5e:2x2
jax: 0.10.0
libtpu: 0.0.40
codegen_flags: <defaults>
</compile_context>

<pallas_src>
import functools

import jax
import jax.numpy as jnp
from jax.experimental import pallas as pl
from jax.experimental.pallas import tpu as pltpu


def _cdiv(a, b):
    return -(-a // b)


def _round_up(x, m):
    return ((x + m - 1) // m) * m


# -----------------------------------------------------------------------------
# Kernel
# -----------------------------------------------------------------------------
def ffn_kernel(x_ref, w1_ref, b1_ref, w2_ref, b2_ref, g_ref, beta_ref,
               o_ref, acc_ref, xb_ref, *, eps):
    k = pl.program_id(1)

    @pl.when(k == 0)
    def _init():
        acc_ref[...] = jnp.zeros_like(acc_ref)
        # Hoisted activation cast: done once per row tile, reused for every
        # d_ff chunk.
        xb_ref[...] = x_ref[...].astype(xb_ref.dtype)

    # ---- first matmul chunk: relu(x @ W1[:, k] + b1[k]) on the MXU ----------
    h = jnp.dot(xb_ref[...], w1_ref[...], preferred_element_type=jnp.float32)
    h = jnp.maximum(h + b1_ref[...].astype(jnp.float32), 0.0)     # (tm, tf)

    # ---- second matmul chunk, accumulated in f32 -----------------------------
    acc_ref[...] += jnp.dot(h.astype(w2_ref.dtype), w2_ref[...],
                            preferred_element_type=jnp.float32)

    # ---- epilogue on the last d_ff chunk --------------------------------------
    @pl.when(k == pl.num_programs(1) - 1)
    def _finalize():
        x_f32 = x_ref[...].astype(jnp.float32)
        # dropout (eval mode == identity) + output bias + residual
        y = acc_ref[...] + b2_ref[...].astype(jnp.float32) + x_f32
        # LayerNorm over last dim (biased variance, like nn.LayerNorm)
        mean = jnp.mean(y, axis=-1, keepdims=True)
        var = jnp.mean(jnp.square(y - mean), axis=-1, keepdims=True)
        y_hat = (y - mean) * jax.lax.rsqrt(var + eps)
        out = y_hat * g_ref[...].astype(jnp.float32) + beta_ref[...].astype(jnp.float32)
        o_ref[...] = out.astype(o_ref.dtype)


# -----------------------------------------------------------------------------
# Generation / tile selection
# -----------------------------------------------------------------------------
_TM_TARGET = {"v5e": 256, "v6e": 768, "v7x": 512}


def _tpu_env():
    """Best-effort (generation, vmem_capacity_bytes) with safe fallbacks."""
    kind = ""
    try:
        kind = jax.devices()[0].device_kind.lower()
    except Exception:
        pass
    if "v7" in kind or "7x" in kind:
        gen, cap = "v7x", 64 << 20
    elif "v6" in kind:
        gen, cap = "v6e", 128 << 20
    elif "v5" in kind:
        gen, cap = "v5e", 128 << 20
    else:
        gen, cap = "unknown", 64 << 20
    try:
        info = pltpu.get_tpu_info()
        q = int(getattr(info, "vmem_capacity_bytes", 0) or 0)
        if q > 0:
            cap = q
    except Exception:
        pass
    return gen, cap


def _pick_tiles(M, d_model, d_ff, x_bytes, out_bytes, w_bytes, tile_m, tile_ff):
    gen, cap = _tpu_env()
    if gen in ("v5e", "v6e"):
        budget = min(cap, 110 << 20)       # use most of the 128 MiB
        ceiling = 110 << 20
    elif gen == "v7x":
        budget = min(cap, 52 << 20)        # leave headroom in 64 MiB
        ceiling = 56 << 20
    else:
        budget = min(cap, 48 << 20)
        ceiling = 64 << 20

    # bf16 x/out wants 16-row multiples (sublane packing); f32 wants 8.
    row_align = 8 if (x_bytes >= 4 and out_bytes >= 4) else 16

    # ---- row tile ------------------------------------------------------------
    tm = _TM_TARGET.get(gen, 256) if tile_m is None else tile_m
    tm = min(tm, _round_up(M, row_align))
    tm = max(_round_up(tm, row_align), row_align)
    if (gen == "v7x" and tile_m is None and _cdiv(M, tm) < 2
            and M >= 2 * row_align):
        # keep both TensorCores of a v7x chip busy for small batches
        tm = _round_up(_cdiv(M, 2), row_align)

    # ---- d_ff chunk (byte-based, d_model- and buffering-aware) ---------------
    fixed = (2 * tm * d_model * x_bytes          # x tile, double-buffered
             + 2 * tm * d_model * out_bytes      # out tile, double-buffered
             + tm * d_model * 4                  # f32 accumulator scratch
             + tm * d_model * w_bytes            # cached bf16 x scratch
             + 3 * d_model * 4 * 2)              # b2 / gamma / beta
    avail = max(budget - fixed, 0)

    def chunk_cost(tf, nbuf):
        return (nbuf * 2 * d_model * tf * w_bytes   # W1 + W2 chunks
                + nbuf * tf * 4                     # b1 chunk
                + tm * tf * 4)                      # f32 intermediate h

    if tile_ff is not None:
        assert d_ff % tile_ff == 0
        assert tile_ff == d_ff or tile_ff % 128 == 0
        tf = tile_ff
    elif chunk_cost(d_ff, 1) <= avail:
        tf = d_ff                                   # fully resident weights
    else:
        tf = None
        for cand in (4096, 2048, 1024, 512, 256, 128):
            if cand < d_ff and d_ff % cand == 0 and chunk_cost(cand, 2) <= avail:
                tf = cand
                break
        if tf is None:
            # No fitting multiple-of-128 divisor: smallest legal chunk.
            tf = next((c for c in (128, 256, 512) if d_ff % c == 0), d_ff)
    nk = d_ff // tf

    vmem_limit = fixed + chunk_cost(tf, 1 if nk == 1 else 2)
    vmem_limit = int(vmem_limit * 1.25) + (2 << 20)
    vmem_limit = max(24 << 20, min(vmem_limit, ceiling))
    return tm, tf, nk, int(vmem_limit)


def _block_spec(shape, index_map, buffers=None):
    """BlockSpec; single-buffer grid-invariant blocks when supported."""
    if buffers is not None and hasattr(pl, "Buffered"):
        try:
            return pl.BlockSpec(shape, index_map, pipeline_mode=pl.Buffered(buffers))
        except TypeError:
            pass
    return pl.BlockSpec(shape, index_map)


# -----------------------------------------------------------------------------
# Wrapper
# -----------------------------------------------------------------------------
def feed_forward(x, w1, b1, w2, b2, gamma, beta, *, eps=1e-5,
                 tile_m=None, tile_ff=None, matmul_dtype=jnp.bfloat16):
    """x: (batch, seq, d_model). Weights stored as (in, out). Returns x's shape/dtype."""
    batch, seq, d_model = x.shape
    d_ff = w1.shape[1]
    M = batch * seq

    w_bytes = jnp.dtype(matmul_dtype).itemsize
    tm, tf, nk, vmem_limit = _pick_tiles(
        M, d_model, d_ff, x.dtype.itemsize, x.dtype.itemsize, w_bytes,
        tile_m, tile_ff)
    resident = nk == 1

    x2d = x.reshape(M, d_model)

    # NOTE: for repeated inference, store W1/W2 in `matmul_dtype` at rest so
    # these casts are no-ops rather than per-call HBM copies.
    w1c = w1 if w1.dtype == matmul_dtype else w1.astype(matmul_dtype)
    w2c = w2 if w2.dtype == matmul_dtype else w2.astype(matmul_dtype)
    b1_2d = b1.reshape(1, d_ff).astype(jnp.float32)
    b2_2d = b2.reshape(1, d_model).astype(jnp.float32)
    g_2d = gamma.reshape(1, d_model).astype(jnp.float32)
    be_2d = beta.reshape(1, d_model).astype(jnp.float32)

    # Ragged last row-tile handled by Pallas masked boundary blocks (per-row
    # math, so padded rows cannot contaminate valid rows) -> no wrapper pad.
    grid = (_cdiv(M, tm), nk)

    w_buf = 1 if resident else None   # single-buffer weights when resident
    in_specs = [
        _block_spec((tm, d_model), lambda i, k: (i, 0)),                 # x rows
        _block_spec((d_model, tf), lambda i, k: (0, k), buffers=w_buf),  # W1 chunk
        _block_spec((1, tf), lambda i, k: (0, k), buffers=w_buf),        # b1 chunk
        _block_spec((tf, d_model), lambda i, k: (k, 0), buffers=w_buf),  # W2 chunk
        _block_spec((1, d_model), lambda i, k: (0, 0), buffers=1),       # b2
        _block_spec((1, d_model), lambda i, k: (0, 0), buffers=1),       # gamma
        _block_spec((1, d_model), lambda i, k: (0, 0), buffers=1),       # beta
    ]

    out2d = pl.pallas_call(
        functools.partial(ffn_kernel, eps=eps),
        out_shape=jax.ShapeDtypeStruct((M, d_model), x.dtype),
        grid_spec=pltpu.PrefetchScalarGridSpec(
            num_scalar_prefetch=0,
            grid=grid,
            in_specs=in_specs,
            out_specs=pl.BlockSpec((tm, d_model), lambda i, k: (i, 0)),
            scratch_shapes=[pltpu.VMEM((tm, d_model), jnp.float32),   # f32 acc
                            pltpu.VMEM((tm, d_model), matmul_dtype)],  # cached x
        ),
        compiler_params=pltpu.CompilerParams(
            dimension_semantics=("parallel", "arbitrary"),
            vmem_limit_bytes=vmem_limit),
    )(x2d, w1c, b1_2d, w2c, b2_2d, g_2d, be_2d)

    return out2d.reshape(batch, seq, d_model)


# -----------------------------------------------------------------------------
# Reference + demo
# -----------------------------------------------------------------------------
def _reference(x, w1, b1, w2, b2, gamma, beta, eps=1e-5):
    h = jnp.maximum(x @ w1 + b1, 0.0)
    y = h @ w2 + b2
    y = y + x
    mean = jnp.mean(y, axis=-1, keepdims=True)
    var = jnp.mean(jnp.square(y - mean), axis=-1, keepdims=True)
    return (y - mean) * jax.lax.rsqrt(var + eps) * gamma + beta


def _make_params(key, d_model, d_ff):
    k1, k2, k3, k4 = jax.random.split(key, 4)
    w1 = jax.random.normal(k1, (d_model, d_ff), dtype=jnp.float32) * 0.05
    b1 = jax.random.normal(k2, (d_ff,), dtype=jnp.float32) * 0.05
    w2 = jax.random.normal(k3, (d_ff, d_model), dtype=jnp.float32) * 0.05
    b2 = jax.random.normal(k4, (d_model,), dtype=jnp.float32) * 0.05
    gamma = jnp.ones((d_model,), dtype=jnp.float32)
    beta = jnp.zeros((d_model,), dtype=jnp.float32)
    return w1, b1, w2, b2, gamma, beta


if __name__ == "__main__":
    key = jax.random.PRNGKey(0)

    # --- small shape consistent with the module --------------------------------
    batch, seq, d_model, d_ff = 2, 8, 32, 64
    kx, kp = jax.random.split(key)
    x = jax.random.normal(kx, (batch, seq, d_model), dtype=jnp.float32)
    params = _make_params(kp, d_model, d_ff)

    out = jax.block_until_ready(feed_forward(x, *params))
    ref = _reference(x, *params)
    assert out.shape == x.shape
    # bf16 matmul operands (f32 accumulation) -> relaxed tolerance vs f32 ref.
    assert jnp.allclose(out, ref, atol=5e-2, rtol=5e-2)

    # --- second shape exercising the ragged row tile + the d_ff reduction axis -
    batch2, seq2, d_model2, d_ff2 = 2, 68, 128, 256   # M=136 -> ragged last tile
    kx2, kp2 = jax.random.split(kp)
    x2 = jax.random.normal(kx2, (batch2, seq2, d_model2), dtype=jnp.float32)
    params2 = _make_params(kp2, d_model2, d_ff2)

    out2 = jax.block_until_ready(
        feed_forward(x2, *params2, tile_m=128, tile_ff=128))
    ref2 = _reference(x2, *params2)
    assert out2.shape == x2.shape
    assert jnp.allclose(out2, ref2, atol=5e-2, rtol=5e-2)

    print("KERNEL_OK")
</pallas_src>

<mosaic_0001>
module attributes {stable_mosaic.version = 11 : i64} {
  func.func @ffn_kernel(%arg0: i32, %arg1: i32, %arg2: memref<16x32xf32, #tpu.memory_space<vmem>>, %arg3: memref<32x64xbf16, #tpu.memory_space<vmem>>, %arg4: memref<1x64xf32, #tpu.memory_space<vmem>>, %arg5: memref<64x32xbf16, #tpu.memory_space<vmem>>, %arg6: memref<1x32xf32, #tpu.memory_space<vmem>>, %arg7: memref<1x32xf32, #tpu.memory_space<vmem>>, %arg8: memref<1x32xf32, #tpu.memory_space<vmem>>, %arg9: memref<16x32xf32, #tpu.memory_space<vmem>>, %arg10: memref<16x32xf32, #tpu.memory_space<vmem>>, %arg11: memref<16x32xbf16, #tpu.memory_space<vmem>>) attributes {dimension_semantics = [#tpu.dimension_semantics<parallel>, #tpu.dimension_semantics<arbitrary>], iteration_bounds = array<i64: 1, 1>, scalar_prefetch = 0 : i64, scratch_operands = 2 : i64, tpu.core_type = #tpu.core_type<tc>, window_params = [{transform_indices = @transform_0, window_bounds = array<i64: 16, 32>}, {pipeline_mode = #tpu.pipeline_mode<synchronous>, transform_indices = @transform_1, window_bounds = array<i64: 32, 64>}, {pipeline_mode = #tpu.pipeline_mode<synchronous>, transform_indices = @transform_2, window_bounds = array<i64: 1, 64>}, {pipeline_mode = #tpu.pipeline_mode<synchronous>, transform_indices = @transform_3, window_bounds = array<i64: 64, 32>}, {pipeline_mode = #tpu.pipeline_mode<synchronous>, transform_indices = @transform_4, window_bounds = array<i64: 1, 32>}, {pipeline_mode = #tpu.pipeline_mode<synchronous>, transform_indices = @transform_5, window_bounds = array<i64: 1, 32>}, {pipeline_mode = #tpu.pipeline_mode<synchronous>, transform_indices = @transform_6, window_bounds = array<i64: 1, 32>}, {transform_indices = @transform_7, window_bounds = array<i64: 16, 32>}]} {
    %c0_i32 = arith.constant 0 : i32
    %0 = arith.cmpi eq, %arg1, %c0_i32 : i32
    %1 = arith.extui %0 : i1 to i32
    %c0_i32_0 = arith.constant 0 : i32
    %2 = arith.cmpi ne, %1, %c0_i32_0 : i32
    scf.if %2 {
      %cst_16 = arith.constant 0.000000e+00 : f32
      %20 = vector.broadcast %cst_16 : f32 to vector<16x32xf32>
      %c0_17 = arith.constant 0 : index
      %c0_18 = arith.constant 0 : index
      %21 = vector.load %arg10[%c0_17, %c0_18] : memref<16x32xf32, #tpu.memory_space<vmem>>, vector<16x32xf32>
      tpu.vector_store %arg10[%c0_17, %c0_18], %20 {strides = array<i32>} : memref<16x32xf32, #tpu.memory_space<vmem>>, vector<16x32xf32>,
      %c0_19 = arith.constant 0 : index
      %c0_20 = arith.constant 0 : index
      %22 = vector.load %arg2[%c0_19, %c0_20] : memref<16x32xf32, #tpu.memory_space<vmem>>, vector<16x32xf32>
      %23 = arith.truncf %22 : vector<16x32xf32> to vector<16x32xbf16>
      %c0_21 = arith.constant 0 : index
      %c0_22 = arith.constant 0 : index
      %24 = vector.load %arg11[%c0_21, %c0_22] : memref<16x32xbf16, #tpu.memory_space<vmem>>, vector<16x32xbf16>
      tpu.vector_store %arg11[%c0_21, %c0_22], %23 {strides = array<i32>} : memref<16x32xbf16, #tpu.memory_space<vmem>>, vector<16x32xbf16>,
    } else {
    }
    %c0 = arith.constant 0 : index
    %c0_1 = arith.constant 0 : index
    %3 = vector.load %arg11[%c0, %c0_1] : memref<16x32xbf16, #tpu.memory_space<vmem>>, vector<16x32xbf16>
    %c0_2 = arith.constant 0 : index
    %c0_3 = arith.constant 0 : index
    %4 = vector.load %arg3[%c0_2, %c0_3] : memref<32x64xbf16, #tpu.memory_space<vmem>>, vector<32x64xbf16>
    %cst = arith.constant dense<0.000000e+00> : vector<16x64xf32>
    %5 = tpu.matmul %3, %4, %cst {dimension_numbers = #tpu.dot_dimension_numbers<[1], [0], [0], [1], [0, 0, 1, 1], [], []>} : vector<16x32xbf16>, vector<32x64xbf16>, vector<16x64xf32> -> vector<16x64xf32>
    %c0_4 = arith.constant 0 : index
    %c0_5 = arith.constant 0 : index
    %6 = vector.load %arg4[%c0_4, %c0_5] : memref<1x64xf32, #tpu.memory_space<vmem>>, vector<1x64xf32>
    %7 = vector.broadcast %6 : vector<1x64xf32> to vector<16x64xf32>
    %8 = arith.addf %5, %7 : vector<16x64xf32>
    %cst_6 = arith.constant 0.000000e+00 : f32
    %9 = vector.broadcast %cst_6 : f32 to vector<16x64xf32>
    %10 = arith.maximumf %8, %9 : vector<16x64xf32>
    %c0_7 = arith.constant 0 : index
    %c0_8 = arith.constant 0 : index
    %11 = vector.load %arg10[%c0_7, %c0_8] : memref<16x32xf32, #tpu.memory_space<vmem>>, vector<16x32xf32>
    %12 = arith.truncf %10 : vector<16x64xf32> to vector<16x64xbf16>
    %c0_9 = arith.constant 0 : index
    %c0_10 = arith.constant 0 : index
    %13 = vector.load %arg5[%c0_9, %c0_10] : memref<64x32xbf16, #tpu.memory_space<vmem>>, vector<64x32xbf16>
    %cst_11 = arith.constant dense<0.000000e+00> : vector<16x32xf32>
    %14 = tpu.matmul %12, %13, %cst_11 {dimension_numbers = #tpu.dot_dimension_numbers<[1], [0], [0], [1], [0, 0, 1, 1], [], []>} : vector<16x64xbf16>, vector<64x32xbf16>, vector<16x32xf32> -> vector<16x32xf32>
    %15 = arith.addf %11, %14 : vector<16x32xf32>
    %c0_12 = arith.constant 0 : index
    %c0_13 = arith.constant 0 : index
    %16 = vector.load %arg10[%c0_12, %c0_13] : memref<16x32xf32, #tpu.memory_space<vmem>>, vector<16x32xf32>
    tpu.vector_store %arg10[%c0_12, %c0_13], %15 {strides = array<i32>} : memref<16x32xf32, #tpu.memory_space<vmem>>, vector<16x32xf32>,
    %c0_i32_14 = arith.constant 0 : i32
    %17 = arith.cmpi eq, %arg1, %c0_i32_14 : i32
    %18 = arith.extui %17 : i1 to i32
    %c0_i32_15 = arith.constant 0 : i32
    %19 = arith.cmpi ne, %18, %c0_i32_15 : i32
    scf.if %19 {
      %c0_16 = arith.constant 0 : index
      %c0_17 = arith.constant 0 : index
      %20 = vector.load %arg2[%c0_16, %c0_17] : memref<16x32xf32, #tpu.memory_space<vmem>>, vector<16x32xf32>
      %c0_18 = arith.constant 0 : index
      %c0_19 = arith.constant 0 : index
      %21 = vector.load %arg10[%c0_18, %c0_19] : memref<16x32xf32, #tpu.memory_space<vmem>>, vector<16x32xf32>
      %c0_20 = arith.constant 0 : index
      %c0_21 = arith.constant 0 : index
      %22 = vector.load %arg6[%c0_20, %c0_21] : memref<1x32xf32, #tpu.memory_space<vmem>>, vector<1x32xf32>
      %23 = vector.broadcast %22 : vector<1x32xf32> to vector<16x32xf32>
      %24 = arith.addf %21, %23 : vector<16x32xf32>
      %25 = arith.addf %24, %20 : vector<16x32xf32>
      %cst_22 = arith.constant dense<0.000000e+00> : vector<16xf32>
      %26 = vector.multi_reduction <add>, %25, %cst_22 [1] : vector<16x32xf32> to vector<16xf32>
      %27 = vector.shape_cast %26 : vector<16xf32> to vector<16x1xf32>
      %cst_23 = arith.constant 3.200000e+01 : f32
      %28 = vector.broadcast %cst_23 : f32 to vector<16x1xf32>
      %29 = arith.divf %27, %28 : vector<16x1xf32>
      %30 = vector.broadcast %29 : vector<16x1xf32> to vector<16x32xf32>
      %31 = arith.subf %25, %30 : vector<16x32xf32>
      %32 = arith.mulf %31, %31 : vector<16x32xf32>
      %cst_24 = arith.constant dense<0.000000e+00> : vector<16xf32>
      %33 = vector.multi_reduction <add>, %32, %cst_24 [1] : vector<16x32xf32> to vector<16xf32>
      %34 = vector.shape_cast %33 : vector<16xf32> to vector<16x1xf32>
      %cst_25 = arith.constant 3.200000e+01 : f32
      %35 = vector.broadcast %cst_25 : f32 to vector<16x1xf32>
      %36 = arith.divf %34, %35 : vector<16x1xf32>
      %37 = vector.broadcast %29 : vector<16x1xf32> to vector<16x32xf32>
      %38 = arith.subf %25, %37 : vector<16x32xf32>
      %cst_26 = arith.constant 9.99999974E-6 : f32
      %39 = vector.broadcast %cst_26 : f32 to vector<16x1xf32>
      %40 = arith.addf %36, %39 : vector<16x1xf32>
      %41 = math.rsqrt %40 : vector<16x1xf32>
      %42 = vector.broadcast %41 : vector<16x1xf32> to vector<16x32xf32>
      %43 = arith.mulf %38, %42 : vector<16x32xf32>
      %c0_27 = arith.constant 0 : index
      %c0_28 = arith.constant 0 : index
      %44 = vector.load %arg7[%c0_27, %c0_28] : memref<1x32xf32, #tpu.memory_space<vmem>>, vector<1x32xf32>
      %45 = vector.broadcast %44 : vector<1x32xf32> to vector<16x32xf32>
      %46 = arith.mulf %43, %45 : vector<16x32xf32>
      %c0_29 = arith.constant 0 : index
      %c0_30 = arith.constant 0 : index
      %47 = vector.load %arg8[%c0_29, %c0_30] : memref<1x32xf32, #tpu.memory_space<vmem>>, vector<1x32xf32>
      %48 = vector.broadcast %47 : vector<1x32xf32> to vector<16x32xf32>
      %49 = arith.addf %46, %48 : vector<16x32xf32>
      %c0_31 = arith.constant 0 : index
      %c0_32 = arith.constant 0 : index
      %50 = vector.load %arg9[%c0_31, %c0_32] : memref<16x32xf32, #tpu.memory_space<vmem>>, vector<16x32xf32>
      tpu.vector_store %arg9[%c0_31, %c0_32], %49 {strides = array<i32>} : memref<16x32xf32, #tpu.memory_space<vmem>>, vector<16x32xf32>,
    } else {
    }
    return
  }
  func.func @transform_0(%arg0: i32, %arg1: i32) -> (i32, i32) {
    %c0_i32 = arith.constant 0 : i32
    %c0_i32_0 = arith.constant 0 : i32
    return %arg0, %c0_i32 : i32, i32
  }
  func.func @transform_1(%arg0: i32, %arg1: i32) -> (i32, i32) {
    %c0_i32 = arith.constant 0 : i32
    %c0_i32_0 = arith.constant 0 : i32
    return %c0_i32, %arg1 : i32, i32
  }
  func.func @transform_2(%arg0: i32, %arg1: i32) -> (i32, i32) {
    %c0_i32 = arith.constant 0 : i32
    %c0_i32_0 = arith.constant 0 : i32
    return %c0_i32, %arg1 : i32, i32
  }
  func.func @transform_3(%arg0: i32, %arg1: i32) -> (i32, i32) {
    %c0_i32 = arith.constant 0 : i32
    %c0_i32_0 = arith.constant 0 : i32
    return %arg1, %c0_i32 : i32, i32
  }
  func.func @transform_4(%arg0: i32, %arg1: i32) -> (i32, i32) {
    %c0_i32 = arith.constant 0 : i32
    %c0_i32_0 = arith.constant 0 : i32
    %c0_i32_1 = arith.constant 0 : i32
    return %c0_i32, %c0_i32_0 : i32, i32
  }
  func.func @transform_5(%arg0: i32, %arg1: i32) -> (i32, i32) {
    %c0_i32 = arith.constant 0 : i32
    %c0_i32_0 = arith.constant 0 : i32
    %c0_i32_1 = arith.constant 0 : i32
    return %c0_i32, %c0_i32_0 : i32, i32
  }
  func.func @transform_6(%arg0: i32, %arg1: i32) -> (i32, i32) {
    %c0_i32 = arith.constant 0 : i32
    %c0_i32_0 = arith.constant 0 : i32
    %c0_i32_1 = arith.constant 0 : i32
    return %c0_i32, %c0_i32_0 : i32, i32
  }
  func.func @transform_7(%arg0: i32, %arg1: i32) -> (i32, i32) {
    %c0_i32 = arith.constant 0 : i32
    %c0_i32_0 = arith.constant 0 : i32
    return %arg0, %c0_i32 : i32, i32
  }
}

</mosaic_0001>

<bundles_post_ra>
// kernel: tpu_custom_call.1
= control target key start
LH: loop header
LB: loop body
LE: loop exit
PB: predicated region body
PF: predicated region fallthrough
CT: control target
= control target key end

     0   :  { %vm39_vm0 = vcmask 257024   ;;  %s417_s0 = inlined_call_operand.vmem [shape: f32[16,32], index: 0, kind: input, shape index: {}]   ;;  %s418_s1 = inlined_call_operand.vmem [shape: bf16[32,64], index: 1, kind: input, shape index: {}]   ;;  %s419_s2 = inlined_call_operand.vmem [shape: f32[1,64], index: 2, kind: input, shape index: {}]   ;;  %s420_s3 = inlined_call_operand.vmem [shape: bf16[64,32], index: 3, kind: input, shape index: {}]   ;;  %s421_s4 = inlined_call_operand.vmem [shape: f32[1,32], index: 4, kind: input, shape index: {}]   ;;  %s422_s5 = inlined_call_operand.vmem [shape: f32[1,32], index: 5, kind: input, shape index: {}]   ;;  %s423_s6 = inlined_call_operand.vmem [shape: f32[1,32], index: 6, kind: input, shape index: {}]   ;;  %s424_s7 = inlined_call_operand.hbm [shape: f32[16,32], index: 7, kind: output, shape index: {}]  }
   0x1   :  { %v276_v0 = vld [vmem:[%s418_s1 + $0x8] sm:$0xff]  ;;  %v35_v1 = vld [vmem:[%s417_s0] sm:$0xff] }
   0x2   :  { %v275_v2 = vld [vmem:[%s418_s1] sm:$0xff]  ;;  %v36_v3 = vld [vmem:[%s417_s0 + $0x8] sm:$0xff]  ;;  %v37_v4 = vpack.c.bf16 %v35_v1, %v35_v1  ;;  %79 = vmatpush.bf16.msra.mxu0 %v276_v0 }
   0x3   :  { %v38_v5 = vpack.c.bf16 %v36_v3, %v36_v3 }
   0x4   :  { %12 = vsyncpa [#allocation5], 0  ;;  %40 = vst.msk [vmem:[#allocation3] sm:$0xf] %vm39_vm0, %v37_v4  ;;  %vm32_vm1 = vcmask 261120   ;;  %v280_v7 = vld [vmem:[%s420_s3 + $0x18] sm:$0xff] }
   0x5   :  { %41 = vst.msk [vmem:[#allocation3 + $0x4] sm:$0xf] %vm39_vm0, %v38_v5  ;;  %132 = vmatpush.bf16.msra.mxu1 %v280_v7  ;;  %v279_v8 = vld [vmem:[%s420_s3 + $0x10] sm:$0xff]  ;;  %v278_v9 = vld [vmem:[%s420_s3 + $0x8] sm:$0xff]  ;;  %v277_v10 = vld [vmem:[%s420_s3] sm:$0xff]  ;;  %v322_v11 = vmov 0.0  }
   0x6   :  { %80 = vmatpush.bf16.msra.mxu0 %v275_v2  ;;  %33 = vst.msk [vmem:[#allocation2] sm:$0xff] %vm32_vm1, %v322_v11  ;;  %v286_v13 = vld [vmem:[%s419_s2] ss:$0 sm:$0xff]  ;;  %vm124_vm2 = vcmask 523264   ;;  %v323_v35 = vmov 32.0   ;;  %s232_s23 = sshll.u32 %s424_s7, 4  ;;  %s233_s23 = int_to_ptr.hbm [resolvable:$true] %s232_s23 }
   0x7   :  { %34 = vst.msk [vmem:[#allocation2 + $0x8] sm:$0xff] %vm32_vm1, %v322_v11  ;;  %v287_v24 = vld [vmem:[%s421_s4] ss:$0 sm:$0xff]  ;;  %290 = vrcp.f32 %v323_v35  ;;  %s326_s24 = smov 8  }
   0x8   :  { %v288_v2 = vld [vmem:[%s422_s5] ss:$0 sm:$0xff]  ;;  %s324_s5 = smov [#allocation4]  }
   0x9   :  { %133 = vmatpush.bf16.msra.mxu1 %v279_v8  ;;  %s230_s20 = sshll.u32 %s324_s5, 4  ;;  %s231_s20 = int_to_ptr.vmem [resolvable:$true] %s230_s20 }
   0xc   :  { %v274_v6 = vld [vmem:[#allocation3] sm:$0xff] }
   0xd   :  { %256 = vmatmul.msk.bf16.vlgmr.msra.gmra.mxu0 %vm32_vm1, %v274_v6  ;;  %134 = vmatpush.bf16.msra.mxu1 %v278_v9  ;;  %v89_v20 = vld [vmem:[#allocation2] sm:$0xff]  ;;  %v291_v36 = vpop.eup %290 }
   0xe   :  { %v90_v23 = vld [vmem:[#allocation2 + $0x8] sm:$0xff]  ;;  %v168_v37 = vmul.f32 32.0, %v291_v36  ;;  %vm172_vm3 = vweird.f32 %v291_v36  ;;  %v289_v6 = vld [vmem:[%s423_s6] ss:$0 sm:$0xff]  ;;  %s325_s6 = smov 128  }
  0x10   :  { %v169_v38 = vsub.f32 1.0, %v168_v37 }
  0x11   :  { %135 = vmatpush.bf16.msra.mxu1 %v277_v10 }
  0x12   :  { %v170_v39 = vmul.f32 %v291_v36, %v169_v38 }
  0x14   :  { %v171_v40 = vadd.f32 %v291_v36, %v170_v39 }
  0x16   :  { %v173_v41 = vsel %vm172_vm3, %v291_v36, %v171_v40 }
  0x8a   :  { %v82_v12 = vpop.f32.mrf.mxu0 }
  0x8b   :  { %v83_v14 = vadd.f32 %v286_v13, %v82_v12 }
  0x8d   :  { %v87_v17 = vmax.f32 %v83_v14, 0.0 }
  0x92   :  { %v84_v15 = vpop.f32.mrf.mxu0 }
  0x93   :  { %v85_v16 = vadd.f32 %v286_v13, %v84_v15 }
  0x95   :  { %v88_v18 = vmax.f32 %v85_v16, 0.0 }
  0x97   :  { %v91_v19 = vpack.c.bf16 %v88_v18, %v87_v17 }
  0x99   :  { %273 = vmatmul.msk.bf16.vlgmr.msra.gmra.mxu1 %vm124_vm2, %v91_v19 }
 0x116   :  { %v137_v21 = vpop.f32.mrf.mxu1 }
 0x117   :  { %v142_v22 = vadd.f32 %v137_v21, %v89_v20 }
 0x119   :  { %144 = vst.msk [vmem:[#allocation2] sm:$0xff] %vm32_vm1, %v142_v22 }
 0x11e   :  { %v139_v25 = vpop.f32.mrf.mxu1 }
 0x11f   :  { %v143_v26 = vadd.f32 %v139_v25, %v90_v23 }
 0x120   :  { %v151_v27 = vld [vmem:[#allocation2] sm:$0xff] }
 0x121   :  { %145 = vst.msk [vmem:[#allocation2 + $0x8] sm:$0xff] %vm32_vm1, %v143_v26  ;;  %v157_v28 = vadd.f32 %v287_v24, %v151_v27 }
 0x123   :  { %v159_v29 = vadd.f32 %v157_v28, %v35_v1 }
 0x125   :  { %v161_v30 = vsel %vm32_vm1, %v159_v29, 0.0 }
 0x126   :  { %162 = vadd.xlane.f32.xlu0 %v161_v30 }
 0x128   :  { %v152_v31 = vld [vmem:[#allocation2 + $0x8] sm:$0xff] }
 0x129   :  { %v158_v32 = vadd.f32 %v287_v24, %v152_v31 }
 0x12b   :  { %v160_v33 = vadd.f32 %v158_v32, %v36_v3 }
 0x12d   :  { %v164_v34 = vsel %vm32_vm1, %v160_v33, 0.0 }
 0x12e   :  { %165 = vadd.xlane.f32.xlu0 %v164_v34 }
 0x199   :  { %v163_v42 = vpop.xlane.xlu0 %162 }
 0x19a   :  { %v174_v43 = vmul.f32 %v173_v41, %v163_v42 }
 0x19c   :  { %v176_v44 = vsub.f32 %v159_v29, %v174_v43 }
 0x19e   :  { %v178_v45 = vmul.f32 %v176_v44, %v176_v44 }
 0x1a0   :  { %v180_v46 = vsel %vm32_vm1, %v178_v45, 0.0 }
 0x1a1   :  { %181 = vadd.xlane.f32.xlu1 %v180_v46  ;;  %v166_v47 = vpop.xlane.xlu0 %165 }
 0x1a2   :  { %v175_v48 = vmul.f32 %v173_v41, %v166_v47 }
 0x1a4   :  { %v177_v49 = vsub.f32 %v160_v33, %v175_v48 }
 0x1a6   :  { %v179_v50 = vmul.f32 %v177_v49, %v177_v49 }
 0x1a8   :  { %v183_v51 = vsel %vm32_vm1, %v179_v50, 0.0 }
 0x1a9   :  { %184 = vadd.xlane.f32.xlu1 %v183_v51 }
 0x214   :  { %v182_v52 = vpop.xlane.xlu1 %181 }
 0x215   :  { %v186_v53 = vmul.f32 %v182_v52, %v173_v41 }
 0x217   :  { %v188_v54 = vadd.f32 1e-05, %v186_v53 }
 0x219   :  { %292 = vrsqrt.f32 %v188_v54  ;;  %vm196_vm5 = vweird.f32 %v188_v54 }
 0x21c   :  { %v185_v55 = vpop.xlane.xlu1 %184 }
 0x21d   :  { %v187_v56 = vmul.f32 %v185_v55, %v173_v41 }
 0x21f   :  { %v293_v57 = vpop.eup %292  ;;  %v189_v58 = vadd.f32 1e-05, %v187_v56 }
 0x220   :  { %v191_v59 = vmul.f32 %v293_v57, %v188_v54  ;;  %vm197_vm4 = vweird.f32 %v293_v57 }
 0x221   :  { %294 = vrsqrt.f32 %v189_v58  ;;  %vm198_vm6 = vmor %vm196_vm5, %vm197_vm4  ;;  %vm206_vm8 = vweird.f32 %v189_v58 }
 0x222   :  { %v192_v60 = vmul.f32 %v293_v57, %v191_v59 }
 0x224   :  { %v193_v61 = vmul.f32 0.5, %v192_v60 }
 0x226   :  { %v194_v62 = vsub.f32 1.5, %v193_v61 }
 0x227   :  { %v295_v63 = vpop.eup %294 }
 0x228   :  { %v195_v0 = vmul.f32 %v293_v57, %v194_v62  ;;  %v201_v1 = vmul.f32 %v295_v63, %v189_v58  ;;  %vm207_vm7 = vweird.f32 %v295_v63 }
 0x229   :  { %vm208_vm9 = vmor %vm206_vm8, %vm207_vm7 }
 0x22a   :  { %v199_v3 = vsel %vm198_vm6, %v293_v57, %v195_v0  ;;  %v202_v4 = vmul.f32 %v295_v63, %v201_v1 }
 0x22b   :  { %v210_v5 = vmul.f32 %v199_v3, %v176_v44 }
 0x22c   :  { %v203_v7 = vmul.f32 0.5, %v202_v4 }
 0x22d   :  { %v216_v8 = vmul.f32 %v288_v2, %v210_v5 }
 0x22e   :  { %v204_v9 = vsub.f32 1.5, %v203_v7 }
 0x22f   :  { %v222_v10 = vadd.f32 %v289_v6, %v216_v8 }
 0x230   :  { %v205_v11 = vmul.f32 %v295_v63, %v204_v9 }
 0x231   :  { %224 = vst.msk [vmem:[#allocation4] sm:$0xff] %vm32_vm1, %v222_v10 }
 0x232   :  { %v209_v12 = vsel %vm208_vm9, %v295_v63, %v205_v11 }
 0x233   :  { %v211_v13 = vmul.f32 %v209_v12, %v177_v49 }
 0x235   :  { %v217_v14 = vmul.f32 %v288_v2, %v211_v13 }
 0x237   :  { %v223_v15 = vadd.f32 %v289_v6, %v217_v14 }
 0x239   :  { %225 = vst.msk [vmem:[#allocation4 + $0x8] sm:$0xff] %vm32_vm1, %v223_v15 }
 0x23a   :  { %238 = dma.vmem_to_hbm [thread:$0]  %s231_s20, 256, %s233_s23, [#allocation5], %s325_s6, %s325_s6, %s326_s24  }
 0x23b   :  { %320 = dma.done.wait [#allocation5], 256  }
 0x23c   :  { %321 = vsyncadd [#allocation5], 4294967040 }
 0x23d   :  { %243 = vsyncpa [#allocation5], 1 }

</bundles_post_ra>
